<compile_context>
chip_gen: v5e
topology: v5e:2x2
jax: 0.10.0
libtpu: 0.0.40
codegen_flags: <defaults>
</compile_context>

<pallas_src>
import jax
import jax.numpy as jnp
from jax.experimental import pallas as pl
from jax.experimental.pallas import tpu as pltpu


# ----------------------------------------------------------------------------
# Placeholder hot paths
# ----------------------------------------------------------------------------

def identity(x: jax.Array) -> jax.Array:
    """Fastest identity: no kernel, no HBM traffic (review's top recommendation)."""
    return x


def _hbm_copy_kernel(x_hbm_ref, o_hbm_ref, sem):
    # Single HBM->HBM DMA: no HBM->VMEM->vreg->VMEM->HBM round trip,
    # no kernel-body vector loads/stores (v5e has only 1 vst slot anyway).
    cp = pltpu.make_async_copy(x_hbm_ref, o_hbm_ref, sem)
    cp.start()
    cp.wait()


def pallas_hbm_copy(x: jax.Array) -> jax.Array:
    """Whole-array copy as one HBM->HBM DMA issued from a Pallas kernel."""
    return pl.pallas_call(
        _hbm_copy_kernel,
        out_shape=jax.ShapeDtypeStruct(x.shape, x.dtype),
        # Raw HBM refs: no auto-DMA tiling, no VMEM double buffers, so there is
        # no VMEM budget to tune per generation (v7x's 64 MiB/TC included).
        in_specs=[pl.BlockSpec(memory_space=pl.ANY)],
        out_specs=pl.BlockSpec(memory_space=pl.ANY),
        scratch_shapes=[pltpu.SemaphoreType.DMA],
    )(x)


_SMALL_BYTES = 1 << 20  # ~1 MiB: below this, launch overhead dominates the copy.


def copy_array(x: jax.Array, *, force_kernel: bool = False) -> jax.Array:
    """Copy helper with a small-input fast path (skips the kernel launch)."""
    nbytes = x.size * jnp.dtype(x.dtype).itemsize
    if not force_kernel and nbytes < _SMALL_BYTES:
        return identity(x)
    return pallas_hbm_copy(x)


# ----------------------------------------------------------------------------
# Discriminator (faithful mirror of the empty PyTorch module)
# ----------------------------------------------------------------------------

class Discriminator:
    """JAX/Pallas mirror of the (empty) PyTorch Discriminator."""

    def __init__(self):
        # Reference __init__ defines no parameters.
        # TODO(synk): reference module body is `pass`; no weights to initialize.
        pass

    def forward(self):
        # Reference forward() takes no inputs and returns None (body is `pass`).
        # TODO(synk): reference forward has no computation to translate.
        return None

    def __call__(self):
        return self.forward()


# ----------------------------------------------------------------------------
# Demo
# ----------------------------------------------------------------------------

if __name__ == "__main__":
    key = jax.random.PRNGKey(0)
    k_small, k_big = jax.random.split(key)

    # --- 1) Small input: fast path, no kernel launch. ------------------------
    x_small = jax.random.normal(k_small, (16, 256), dtype=jnp.float32)
    y_small = copy_array(x_small)            # identity fast path (no pallas_call)
    jax.block_until_ready(y_small)
    assert y_small.shape == x_small.shape and y_small.dtype == x_small.dtype
    assert bool(jnp.array_equal(y_small, x_small))

    # --- 2) Exercise the Pallas DMA-copy kernel once (forced, small shape). --
    x = jax.random.normal(k_big, (256, 256), dtype=jnp.float32)   # 256 KiB
    y = copy_array(x, force_kernel=True)      # single HBM->HBM DMA via Pallas
    jax.block_until_ready(y)
    assert y.shape == x.shape and y.dtype == x.dtype
    assert bool(jnp.array_equal(y, x))

    # --- 3) Discriminator itself: forward() must return None, like the stub. -
    disc = Discriminator()
    out = disc()
    assert out is None

    print("KERNEL_OK")
</pallas_src>

<mosaic_0001>
module attributes {stable_mosaic.version = 11 : i64} {
  func.func @_hbm_copy_kernel(%arg0: memref<256x256xf32, #tpu.memory_space<any>>, %arg1: memref<256x256xf32, #tpu.memory_space<any>>, %arg2: memref<!tpu.dma_semaphore, #tpu.memory_space<semaphore_mem>>) attributes {dimension_semantics = [], scalar_prefetch = 0 : i64, scratch_operands = 1 : i64, tpu.core_type = #tpu.core_type<tc>} {
    tpu.enqueue_dma source(%arg0 : memref<256x256xf32, #tpu.memory_space<any>>) target(%arg1 : memref<256x256xf32, #tpu.memory_space<any>>) target_semaphore(%arg2 : memref<!tpu.dma_semaphore, #tpu.memory_space<semaphore_mem>>)
    tpu.wait_dma2 semaphore(%arg2 : memref<!tpu.dma_semaphore, #tpu.memory_space<semaphore_mem>>) src(%arg0 : memref<256x256xf32, #tpu.memory_space<any>>) dst(%arg1 : memref<256x256xf32, #tpu.memory_space<any>>)
    return
  }
}

</mosaic_0001>

<bundles_post_ra>
// kernel: tpu_custom_call.1
= control target key start
LH: loop header
LB: loop body
LE: loop exit
PB: predicated region body
PF: predicated region fallthrough
CT: control target
= control target key end

     0   :  { %s33_s12 = smov [#allocation2]   ;;  %s34_s13 = smov [#allocation3]   ;;  %s52_s0 = inlined_call_operand.hbm [shape: f32[256,256], index: 0, kind: input, shape index: {}]   ;;  %s53_s1 = inlined_call_operand.hbm [shape: f32[256,256], index: 1, kind: output, shape index: {}]  }
   0x1   :  { %s10_s8 = sshll.u32 %s52_s0, 4  ;;  %s12_s11 = sshll.u32 %s53_s1, 4  ;;  %s11_s8 = int_to_ptr.hbm [resolvable:$true] %s10_s8  ;;  %s13_s11 = int_to_ptr.hbm [resolvable:$true] %s12_s11 }
   0x2   :  { %s35_s14 = smov 0  }
   0x3   :  { %16 = dma.general %s11_s8, 8192, %s13_s11, %s33_s12, %s34_s13, [#allocation4], %s35_s14, 0  }
   0x4   :  { %31 = dma.done.wait [#allocation2], 8192 }
   0x5   :  { %32 = vsyncadd [#allocation2], 4294959104 }
   0x6   :  { %21 = vsyncmov [#allocation2] }
   0x9   :  { %s22_s15 = vpop.sfrf %21 }
   0xa   :  { %p27_p0 = scmp.ne.s32.totalorder %s22_s15, 0 }
   0xc   :  { %26 = shalt.err (%p27_p0)  }

</bundles_post_ra>
